<compile_context>
chip_gen: v7x
topology: tpu7x:2x2x1
jax: 0.10.0
libtpu: 0.0.40
codegen_flags: <defaults>
</compile_context>

<pallas_src>
import functools

import jax
import jax.numpy as jnp
from jax import lax
from jax.experimental import pallas as pl
from jax.experimental.pallas import tpu as pltpu


# --------------------------------------------------------------------------
# Kernel 1: non-trivial Chebyshev supports from node embeddings
#   (the k=0 identity support is skipped -- it is applied implicitly in the cell)
# --------------------------------------------------------------------------
def supports_kernel(e_ref, s_ref, *, cheb_k):
    e = e_ref[...].astype(jnp.float32)                           # [N, D]
    n = e.shape[0]
    # E @ E^T without an explicit transpose: contract dim 1 of both operands.
    a = lax.dot_general(e, e, (((1,), (1,)), ((), ())),
                        preferred_element_type=jnp.float32)      # [N, N]
    a = jnp.maximum(a, 0.0)                                      # relu
    a = a - jnp.max(a, axis=1, keepdims=True)                    # stable softmax (dim=1)
    ea = jnp.exp(a)
    adj = ea / jnp.sum(ea, axis=1, keepdims=True)

    s_ref[0] = adj.astype(s_ref.dtype)                           # T1 = A
    if cheb_k > 2:
        row = lax.broadcasted_iota(jnp.int32, (n, n), 0)
        col = lax.broadcasted_iota(jnp.int32, (n, n), 1)
        eye = (row == col).astype(jnp.float32)
        prev2, prev1 = eye, adj                                  # recursion kept in f32
        for k in range(2, cheb_k):
            cur = 2.0 * jnp.dot(adj, prev1, preferred_element_type=jnp.float32) - prev2
            s_ref[k - 1] = cur.astype(s_ref.dtype)
            prev2, prev1 = prev1, cur


def compute_supports(node_emb, cheb_k, out_dtype=jnp.float32):
    assert cheb_k >= 2, "support stack is [I, A, ...]; cheb_k must be >= 2"
    n, d = node_emb.shape
    return pl.pallas_call(
        functools.partial(supports_kernel, cheb_k=cheb_k),
        out_shape=jax.ShapeDtypeStruct((cheb_k - 1, n, n), out_dtype),
        grid=(1,),
        in_specs=[pl.BlockSpec((n, d), lambda i: (0, 0))],
        out_specs=pl.BlockSpec((cheb_k - 1, n, n), lambda i: (0, 0, 0)),
    )(node_emb)


# --------------------------------------------------------------------------
# Kernel 2: AGCRN cell body (one batch tile per grid step)
# --------------------------------------------------------------------------
def cell_kernel(emb_ref, supp_ref, x_ref, s_ref,
                wgx_ref, wgs_ref, bgp_ref,
                wux_ref, wus_ref, bup_ref,
                out_ref, *,
                cheb_k, din, hidden, embed_dim, batch_tile, compute_dtype):
    f32 = jnp.float32
    cdt = compute_dtype
    bt = batch_tile
    n = emb_ref.shape[0]

    e = emb_ref[...].astype(f32)                   # [N, D]
    e3 = e[:, :, None]                             # hoisted broadcast operand
    x2 = x_ref[...]                                # [N, bt*Din] (cdt), lane-dense (batch, chan)
    s2 = s_ref[...]                                # [N, bt*H]   (cdt)
    s2f = s2.astype(f32)                           # f32 copy for GRU elementwise math

    supp = [supp_ref[j] for j in range(cheb_k - 1)]          # (K-1) x [N, N] (cdt)

    # ---- Stage 1 (MXU): graph mixing with lane-dense RHS; identity term is free -------
    def graph_mix(z2):
        mixed = [z2]                                          # k = 0: identity support
        for j in range(cheb_k - 1):
            mixed.append(jnp.dot(supp[j], z2,
                                 preferred_element_type=f32).astype(cdt))
        return mixed                                          # cheb_k x [N, bt*dim]

    gx = graph_mix(x2)                             # reused by gate AND candidate gconvs
    gs = graph_mix(s2)

    # ---- Stage 2 (MXU, cheb_k fused) + tiny embed-dim epilogue (VPU) -------------------
    wgx = wgx_ref[...]                             # [K*Din, D*2H] (cdt)
    wgs = wgs_ref[...]                             # [K*H,   D*2H]
    wux = wux_ref[...]                             # [K*Din, D*H]
    wus = wus_ref[...]                             # [K*H,   D*H]
    bias_g = jnp.dot(e, bgp_ref[...].astype(f32), preferred_element_type=f32)   # [N, 2H]
    bias_u = jnp.dot(e, bup_ref[...].astype(f32), preferred_element_type=f32)   # [N, H]

    def batch_lhs(mixed, b, width):
        parts = [m[:, b * width:(b + 1) * width] for m in mixed]   # cheb_k x [N, width]
        return jnp.concatenate(parts, axis=1)                      # [N, K*width]

    def gconv(lhs_x, lhs_s, w_x, w_s, bias, out_dim):
        y = (jnp.dot(lhs_x, w_x, preferred_element_type=f32)
             + jnp.dot(lhs_s, w_s, preferred_element_type=f32))    # [N, D*out]
        y3 = y.reshape(n, embed_dim, out_dim)
        # out[n, o] = sum_d E[n, d] * Y[n, d, o] + bias[n, o]
        return jnp.sum(y3 * e3, axis=1) + bias                     # [N, out] (f32)

    # ---- GRU ---------------------------------------------------------------------------
    # TODO(synk): for large batch tiles, replace this static unroll with a lax.fori_loop
    # (or a batch-in-rows Stage-2 formulation) to keep vreg pressure / compile time flat.
    lx_list, r_list, s_list, zs_list = [], [], [], []
    for b in range(bt):
        lx = batch_lhs(gx, b, din)                                 # [N, K*Din]
        ls = batch_lhs(gs, b, hidden)                              # [N, K*H]
        lx_list.append(lx)
        g = jax.nn.sigmoid(gconv(lx, ls, wgx, wgs, bias_g, 2 * hidden))
        z, r = g[:, :hidden], g[:, hidden:]
        s_b = s2f[:, b * hidden:(b + 1) * hidden]
        r_list.append(r)
        s_list.append(s_b)
        zs_list.append(z * s_b)

    zs2 = zs_list[0] if bt == 1 else jnp.concatenate(zs_list, axis=1)   # [N, bt*H]
    gzs = graph_mix(zs2.astype(cdt))

    h_list = []
    for b in range(bt):
        lzs = batch_lhs(gzs, b, hidden)
        hc = gconv(lx_list[b], lzs, wux, wus, bias_u, hidden)
        h_list.append(r_list[b] * s_list[b] + (1.0 - r_list[b]) * jnp.tanh(hc))

    h2 = h_list[0] if bt == 1 else jnp.concatenate(h_list, axis=1)      # [N, bt*H]
    out_ref[...] = h2.astype(out_ref.dtype)


# --------------------------------------------------------------------------
# Wrapper-side preparation (call ONCE per sequence, not per time step)
# --------------------------------------------------------------------------
def _stack_pool(wpool, din, hidden, cheb_k, d_emb, out_dim, cdt):
    # weights[n,k,c,o] = sum_d E[n,d] * wpool[d,k,c,o]; stacked so ONE deep matmul per
    # operand covers all cheb_k terms: rows ordered (k, c), cols ordered (d, o).
    wt = jnp.transpose(wpool, (1, 2, 0, 3))                      # [K, C, D, out]
    w_x = wt[:, :din].reshape(cheb_k * din, d_emb * out_dim)
    w_s = wt[:, din:].reshape(cheb_k * hidden, d_emb * out_dim)
    return w_x.astype(cdt), w_s.astype(cdt)


def prepare_agcrn_cell(node_emb, gate_wpool, gate_bpool, upd_wpool, upd_bpool,
                       cheb_k, hidden, *, compute_dtype=jnp.float32):
    assert cheb_k >= 2, "AGCRNCell requires cheb_k >= 2 (support stack is [I, A, ...])."
    n, d_emb = node_emb.shape
    din = gate_wpool.shape[2] - hidden
    assert din >= 1
    cdt = compute_dtype
    supports = compute_supports(node_emb.astype(jnp.float32), cheb_k, cdt)   # [K-1, N, N]
    wgx, wgs = _stack_pool(gate_wpool, din, hidden, cheb_k, d_emb, 2 * hidden, cdt)
    wux, wus = _stack_pool(upd_wpool, din, hidden, cheb_k, d_emb, hidden, cdt)
    return dict(node_emb=node_emb.astype(jnp.float32), supports=supports,
                wgx=wgx, wgs=wgs, bgp=gate_bpool.astype(jnp.float32),
                wux=wux, wus=wus, bup=upd_bpool.astype(jnp.float32),
                n=n, d_emb=d_emb, din=din, hidden=hidden, cheb_k=cheb_k,
                compute_dtype=cdt)


def _pick_batch_tile(batch, din, hidden):
    # Smallest batch tile whose per-tile lane widths (bt*din, bt*hidden) stay 128-aligned:
    # >=2 grid steps (keeps both v7x TensorCores busy), bounded unroll / live temporaries.
    for cand in range(1, batch):
        if batch % cand == 0 and (cand * din) % 128 == 0 and (cand * hidden) % 128 == 0:
            return cand
    # TODO(synk): lane-pad per-batch chunks to 128 so small-B / small-din cases can still
    # be split into >=2 grid steps instead of this single-step (full-array block) fallback.
    return batch


def _vmem_limit_bytes(n, d_emb, din, hidden, cheb_k, bt, itemsize):
    sup = (cheb_k - 1) * n * n * itemsize
    pools = cheb_k * (din + hidden) * d_emb * 3 * hidden * itemsize + 4 * d_emb * 3 * hidden
    blocks = 2 * n * bt * (din + 2 * hidden) * itemsize            # x/state/out blocks (x2 bufs)
    mixes = cheb_k * n * bt * (din + 2 * hidden) * itemsize        # gx, gs, gzs
    gru = 8 * n * bt * hidden * 4                                  # f32 GRU temporaries
    est = sup + pools + blocks + mixes + gru
    # Explicit scoped-VMEM request: generous headroom, but never above v7x's 64 MiB.
    return int(min(max(4 * est, 32 * 1024 * 1024), 64 * 1024 * 1024))


def agcrn_cell_lane(prep, x_ln, s_ln, batch, *, batch_tile=None):
    """Cell on lane-dense operands: x_ln [N, B*Din], s_ln [N, B*H] -> h_ln [N, B*H].
    For RNN loops over time, keep the state in this layout between steps."""
    n, d_emb = prep["n"], prep["d_emb"]
    din, hidden, cheb_k = prep["din"], prep["hidden"], prep["cheb_k"]
    cdt = prep["compute_dtype"]
    bt = _pick_batch_tile(batch, din, hidden) if batch_tile is None else batch_tile
    assert batch % bt == 0
    n_tiles = batch // bt
    vmem_limit = _vmem_limit_bytes(n, d_emb, din, hidden, cheb_k, bt,
                                   jnp.dtype(cdt).itemsize)

    kernel = functools.partial(
        cell_kernel, cheb_k=cheb_k, din=din, hidden=hidden,
        embed_dim=d_emb, batch_tile=bt, compute_dtype=cdt)

    args = (prep["node_emb"], prep["supports"],
            x_ln.astype(cdt), s_ln.astype(cdt),
            prep["wgx"], prep["wgs"], prep["bgp"],
            prep["wux"], prep["wus"], prep["bup"])

    def call(single_buffer_invariants):
        def inv_spec(arr):
            nd = arr.ndim
            if single_buffer_invariants:
                # Grid-invariant block (same index every step): single-buffer it.
                return pl.BlockSpec(arr.shape, lambda i, _nd=nd: (0,) * _nd,
                                    pipeline_mode=pl.Buffered(1))
            return pl.BlockSpec(arr.shape, lambda i, _nd=nd: (0,) * _nd)

        in_specs = [
            inv_spec(prep["node_emb"]),                              # node embeddings
            inv_spec(prep["supports"]),                              # supports [K-1, N, N]
            pl.BlockSpec((n, bt * din), lambda i: (0, i)),           # x     (batch tile)
            pl.BlockSpec((n, bt * hidden), lambda i: (0, i)),        # state (batch tile)
            inv_spec(prep["wgx"]), inv_spec(prep["wgs"]), inv_spec(prep["bgp"]),
            inv_spec(prep["wux"]), inv_spec(prep["wus"]), inv_spec(prep["bup"]),
        ]
        return pl.pallas_call(
            kernel,
            out_shape=jax.ShapeDtypeStruct((n, batch * hidden), cdt),
            grid=(n_tiles,),
            in_specs=in_specs,
            out_specs=pl.BlockSpec((n, bt * hidden), lambda i: (0, i)),
            input_output_aliases={3: 0},        # in-place hidden-state update
            compiler_params=pltpu.CompilerParams(
                dimension_semantics=("parallel",),
                vmem_limit_bytes=vmem_limit),
        )(*args)

    try:
        return call(True)
    except Exception:
        # pipeline_mode=pl.Buffered(1) not accepted by this jax version -> fall back to
        # the default double-buffered pipeline for the grid-invariant operands.
        return call(False)


def agcrn_cell_pallas(x, state, node_emb,
                      gate_wpool, gate_bpool, upd_wpool, upd_bpool,
                      cheb_k, hidden, *,
                      batch_tile=None, compute_dtype=jnp.float32, prep=None):
    """AGCRNCell forward.  x: [B,N,Din], state: [B,N,H], node_emb: [N,D] -> h: [B,N,H].

    compute_dtype=jnp.bfloat16 halves DMA / resident VMEM for supports, pools and
    activations and runs the MXU in bf16 with f32 accumulation (valid on v5e/v6e/v7x;
    GRU elementwise math stays f32).  For RNN use, call prepare_agcrn_cell once and
    agcrn_cell_lane per step with lane-dense state (avoids recomputing supports and
    re-transposing the state every time step).
    """
    b, n_nodes, din = x.shape
    if prep is None:
        prep = prepare_agcrn_cell(node_emb, gate_wpool, gate_bpool, upd_wpool, upd_bpool,
                                  cheb_k, hidden, compute_dtype=compute_dtype)
    assert prep["din"] == din and prep["hidden"] == hidden and prep["n"] == n_nodes
    x_ln = jnp.transpose(x, (1, 0, 2)).reshape(n_nodes, b * din)
    s_ln = jnp.transpose(state, (1, 0, 2)).reshape(n_nodes, b * hidden)
    h_ln = agcrn_cell_lane(prep, x_ln, s_ln, b, batch_tile=batch_tile)
    return jnp.transpose(h_ln.reshape(n_nodes, b, hidden), (1, 0, 2)).astype(x.dtype)


# --------------------------------------------------------------------------
# Pure-JAX reference (mirrors the PyTorch module exactly)
# --------------------------------------------------------------------------
def avwgcn_ref(x, node_emb, wpool, bpool, cheb_k):
    n = node_emb.shape[0]
    adj = jax.nn.softmax(jax.nn.relu(node_emb @ node_emb.T), axis=1)
    supp = [jnp.eye(n, dtype=jnp.float32), adj]
    for _ in range(2, cheb_k):
        supp.append(2.0 * adj @ supp[-1] - supp[-2])
    supports = jnp.stack(supp, axis=0)
    weights = jnp.einsum('nd,dkio->nkio', node_emb, wpool)
    bias = node_emb @ bpool
    x_g = jnp.einsum('knm,bmc->bknc', supports, x)
    x_g = jnp.transpose(x_g, (0, 2, 1, 3))
    return jnp.einsum('bnki,nkio->bno', x_g, weights) + bias


def agcrn_cell_ref(x, state, node_emb,
                   gate_wpool, gate_bpool, upd_wpool, upd_bpool,
                   cheb_k, hidden):
    inp = jnp.concatenate([x, state], axis=-1)
    z_r = jax.nn.sigmoid(avwgcn_ref(inp, node_emb, gate_wpool, gate_bpool, cheb_k))
    z, r = z_r[..., :hidden], z_r[..., hidden:]
    cand = jnp.concatenate([x, z * state], axis=-1)
    hc = jnp.tanh(avwgcn_ref(cand, node_emb, upd_wpool, upd_bpool, cheb_k))
    return r * state + (1.0 - r) * hc


# --------------------------------------------------------------------------
if __name__ == "__main__":
    B, N, DIN, H, CHEB_K, EMBED = 2, 16, 4, 32, 3, 8
    C = DIN + H

    key = jax.random.PRNGKey(0)
    ks = jax.random.split(key, 7)

    x = jax.random.normal(ks[0], (B, N, DIN), dtype=jnp.float32)
    state = jax.random.normal(ks[1], (B, N, H), dtype=jnp.float32)
    node_emb = jax.random.uniform(ks[2], (N, EMBED), dtype=jnp.float32,
                                  minval=-0.5, maxval=0.5)

    def xavier(k, shape):
        fan_in, fan_out = shape[-2], shape[-1]
        lim = (6.0 / (fan_in + fan_out)) ** 0.5
        return jax.random.uniform(k, shape, jnp.float32, -lim, lim)

    gate_wpool = xavier(ks[3], (EMBED, CHEB_K, C, 2 * H))
    gate_bpool = xavier(ks[4], (EMBED, 2 * H))
    upd_wpool = xavier(ks[5], (EMBED, CHEB_K, C, H))
    upd_bpool = xavier(ks[6], (EMBED, H))

    h_ref = agcrn_cell_ref(x, state, node_emb,
                           gate_wpool, gate_bpool, upd_wpool, upd_bpool,
                           CHEB_K, H)
    jax.block_until_ready(h_ref)

    # f32 path (bit-faithful to the module semantics)
    h_f32 = agcrn_cell_pallas(x, state, node_emb,
                              gate_wpool, gate_bpool, upd_wpool, upd_bpool,
                              CHEB_K, H, compute_dtype=jnp.float32)
    jax.block_until_ready(h_f32)
    assert h_f32.shape == (B, N, H)
    assert jnp.allclose(h_f32, h_ref, atol=1e-2, rtol=1e-2), (
        float(jnp.max(jnp.abs(h_f32 - h_ref))))

    # bf16 MXU-operand path (recommended default for v6e/v7x; also valid on v5e) --
    # loose tolerance: sanity check only.
    h_bf16 = agcrn_cell_pallas(x, state, node_emb,
                               gate_wpool, gate_bpool, upd_wpool, upd_bpool,
                               CHEB_K, H, compute_dtype=jnp.bfloat16)
    jax.block_until_ready(h_bf16)
    assert jnp.allclose(h_bf16.astype(jnp.float32), h_ref, atol=1e-1, rtol=1e-1), (
        float(jnp.max(jnp.abs(h_bf16.astype(jnp.float32) - h_ref))))

    print("KERNEL_OK")
</pallas_src>

<mosaic_0001>
module attributes {stable_mosaic.version = 11 : i64} {
  func.func @supports_kernel(%arg0: i32, %arg1: memref<16x8xf32, #tpu.memory_space<vmem>>, %arg2: memref<2x16x16xf32, #tpu.memory_space<vmem>>) attributes {dimension_semantics = [#tpu.dimension_semantics<arbitrary>], iteration_bounds = array<i64: 1>, scalar_prefetch = 0 : i64, scratch_operands = 0 : i64, tpu.core_type = #tpu.core_type<tc>, window_params = [{pipeline_mode = #tpu.pipeline_mode<synchronous>, transform_indices = @transform_0, window_bounds = array<i64: 16, 8>}, {pipeline_mode = #tpu.pipeline_mode<synchronous>, transform_indices = @transform_1, window_bounds = array<i64: 2, 16, 16>}]} {
    %c0 = arith.constant 0 : index
    %c0_0 = arith.constant 0 : index
    %0 = vector.load %arg1[%c0, %c0_0] : memref<16x8xf32, #tpu.memory_space<vmem>>, vector<16x8xf32>
    %cst = arith.constant dense<0.000000e+00> : vector<16x16xf32>
    %1 = tpu.matmul %0, %0, %cst {dimension_numbers = #tpu.dot_dimension_numbers<[1], [1], [0], [0], [0, 0, 1, 0], [], []>} : vector<16x8xf32>, vector<16x8xf32>, vector<16x16xf32> -> vector<16x16xf32>
    %cst_1 = arith.constant 0.000000e+00 : f32
    %2 = vector.broadcast %cst_1 : f32 to vector<16x16xf32>
    %3 = arith.maximumf %1, %2 : vector<16x16xf32>
    %cst_2 = arith.constant dense<0xFF800000> : vector<16xf32>
    %4 = vector.multi_reduction <maximumf>, %3, %cst_2 [1] : vector<16x16xf32> to vector<16xf32>
    %5 = vector.shape_cast %4 : vector<16xf32> to vector<16x1xf32>
    %6 = vector.broadcast %5 : vector<16x1xf32> to vector<16x16xf32>
    %7 = arith.subf %3, %6 : vector<16x16xf32>
    %8 = math.exp %7 : vector<16x16xf32>
    %cst_3 = arith.constant dense<0.000000e+00> : vector<16xf32>
    %9 = vector.multi_reduction <add>, %8, %cst_3 [1] : vector<16x16xf32> to vector<16xf32>
    %10 = vector.shape_cast %9 : vector<16xf32> to vector<16x1xf32>
    %11 = vector.broadcast %10 : vector<16x1xf32> to vector<16x16xf32>
    %12 = arith.divf %8, %11 : vector<16x16xf32>
    %c0_4 = arith.constant 0 : index
    %c0_5 = arith.constant 0 : index
    %c0_6 = arith.constant 0 : index
    %13 = vector.load %arg2[%c0_4, %c0_5, %c0_6] : memref<2x16x16xf32, #tpu.memory_space<vmem>>, vector<1x16x16xf32>
    %14 = vector.shape_cast %13 : vector<1x16x16xf32> to vector<16x16xf32>
    %15 = vector.shape_cast %12 : vector<16x16xf32> to vector<1x16x16xf32>
    tpu.vector_store %arg2[%c0_4, %c0_5, %c0_6], %15 {strides = array<i32>} : memref<2x16x16xf32, #tpu.memory_space<vmem>>, vector<1x16x16xf32>,
    %16 = tpu.iota {dimensions = array<i32: 0>} : vector<16x16xi32>
    %17 = tpu.iota {dimensions = array<i32: 1>} : vector<16x16xi32>
    %18 = arith.cmpi eq, %16, %17 : vector<16x16xi32>
    %19 = arith.extui %18 : vector<16x16xi1> to vector<16x16xi32>
    %20 = arith.sitofp %19 : vector<16x16xi32> to vector<16x16xf32>
    %cst_7 = arith.constant dense<0.000000e+00> : vector<16x16xf32>
    %21 = tpu.matmul %12, %12, %cst_7 {dimension_numbers = #tpu.dot_dimension_numbers<[1], [0], [0], [1], [0, 0, 1, 1], [], []>} : vector<16x16xf32>, vector<16x16xf32>, vector<16x16xf32> -> vector<16x16xf32>
    %cst_8 = arith.constant 2.000000e+00 : f32
    %22 = vector.broadcast %cst_8 : f32 to vector<16x16xf32>
    %23 = arith.mulf %22, %21 : vector<16x16xf32>
    %24 = arith.subf %23, %20 : vector<16x16xf32>
    %c1 = arith.constant 1 : index
    %c0_9 = arith.constant 0 : index
    %c0_10 = arith.constant 0 : index
    %25 = vector.load %arg2[%c1, %c0_9, %c0_10] : memref<2x16x16xf32, #tpu.memory_space<vmem>>, vector<1x16x16xf32>
    %26 = vector.shape_cast %25 : vector<1x16x16xf32> to vector<16x16xf32>
    %27 = vector.shape_cast %24 : vector<16x16xf32> to vector<1x16x16xf32>
    tpu.vector_store %arg2[%c1, %c0_9, %c0_10], %27 {strides = array<i32>} : memref<2x16x16xf32, #tpu.memory_space<vmem>>, vector<1x16x16xf32>,
    return
  }
  func.func @transform_0(%arg0: i32) -> (i32, i32) {
    %c0_i32 = arith.constant 0 : i32
    %c0_i32_0 = arith.constant 0 : i32
    %c0_i32_1 = arith.constant 0 : i32
    return %c0_i32, %c0_i32_0 : i32, i32
  }
  func.func @transform_1(%arg0: i32) -> (i32, i32, i32) {
    %c0_i32 = arith.constant 0 : i32
    %c0_i32_0 = arith.constant 0 : i32
    %c0_i32_1 = arith.constant 0 : i32
    %c0_i32_2 = arith.constant 0 : i32
    return %c0_i32, %c0_i32_0, %c0_i32_1 : i32, i32, i32
  }
}

</mosaic_0001>

<bundles_post_ra>
// kernel: tpu_custom_call.1
= control target key start
LH: loop header
LB: loop body
LE: loop exit
PB: predicated region body
PF: predicated region fallthrough
CT: control target
= control target key end

     0   :  { %vm11_vm0 = vcmask 64512   ;;  %s353_s0 = inlined_call_operand.vmem [shape: f32[16,8], index: 0, kind: input, shape index: {}]   ;;  %s354_s1 = inlined_call_operand.hbm [shape: f32[2,16,16], index: 1, kind: output, shape index: {}]  }
   0x1   :  { %v9_v0 = vld [vmem:[%s353_s0] sm:$0xff]  ;;  %v10_v1 = vld [vmem:[%s353_s0 + $0x8] sm:$0xff] }
   0x2   :  { %6 = vsyncpa [#allocation3], 0  ;;  %v265_v2 = vpack.c.bf16 %v10_v1, %v9_v0  ;;  %255 = vmatprep.mubr.msk.f32.mxu0 %vm11_vm0, %v9_v0  ;;  %vm95_vm2 = vcmask 130048   ;;  %v120_v26 = vlaneseq  ;;  %v311_v30 = vmov 0.0   ;;  %s312_s0 = smov [#allocation2]  }
   0x3   :  { %vm266_vm1 = vmpackc.low %vm11_vm0, %vm11_vm0  ;;  %s224_s10 = sshll.u32 %s312_s0, 4  ;;  %s225_s10 = int_to_ptr.vmem [resolvable:$true] %s224_s10 }
   0x4   :  { %267 = vmatprep.subr.msk.bf16.mxu0 %vm266_vm1, %v265_v2  ;;  %v121_v27 = vshrl.u32 %v120_v26, 7  ;;  %v124_v29 = vand.u32 127, %v120_v26  ;;  %s287_s11 = scalar_lea.vmem %s225_s10, 512  ;;  %p292_p1 = scmp.lt.s32.totalorder %s225_s10, %s225_s10 }
   0x5   :  { %270 = vmatpush3.bf16.xpose.msk.msra.mxu0 %vm266_vm1, %v265_v2  ;;  %p288_p0 = scmp.ne.s32.totalorder %s225_s10, %s287_s11  ;;  %p293_p2 = scmp.lt.s32.totalorder %s287_s11, %s287_s11 }
   0x6   :  { %v122_v28 = vadd.s32 8, %v121_v27  ;;  %vm125_vm4 = vcmp.eq.s32.totalorder %v121_v27, %v124_v29 }
   0x7   :  { %v239_v34 = vsel %vm125_vm4, 1.0, %v311_v30  ;;  %p294_p3 = por %p293_p2, %p292_p1 }
   0x8   :  { %vm126_vm3 = vcmp.eq.s32.totalorder %v122_v28, %v124_v29 }
   0x9   :  { %v240_v31 = vsel %vm126_vm3, 1.0, %v311_v30  ;;  %p295_p4 = pnand %p294_p3, %p288_p0 }
   0xc   :  { %256 = vmatmul.mubr.msk.f32.vlgmr.msra.gmra.mrb[0].mxu0 %vm11_vm0, %v10_v1 }
  0xdf   :  { %v257_v3 = vpop.f32.mrb[0].mxu0 }
  0xe0   :  { %v84_v4 = vpop.f32.mrb[1].mxu0  ;;  %v94_v6 = vmax.f32 %v257_v3, 0.0 }
  0xe1   :  { %v93_v5 = vmax.f32 %v84_v4, 0.0 }
  0xe2   :  { %v99_v8 = vsel %vm95_vm2, %v94_v6, -inf }
  0xe3   :  { %v96_v7 = vsel %vm95_vm2, %v93_v5, -inf }
  0xe4   :  { %97 = vmax.xlane.f32.xlu0 %v96_v7 }
  0xe8   :  { %100 = vmax.xlane.f32.xlu0 %v99_v8 }
 0x171   :  { %v98_v9 = vpop.xlane.xlu0 %97 }
 0x172   :  { %v102_v10 = vsub.f32 %v93_v5, %v98_v9 }
 0x174   :  { %v104_v11 = vmul.f32 1.442695, %v102_v10 }
 0x175   :  { %v101_v12 = vpop.xlane.xlu0 %100 }
 0x176   :  { %279 = vpow2.f32 %v104_v11  ;;  %v103_v13 = vsub.f32 %v94_v6, %v101_v12 }
 0x178   :  { %v106_v14 = vmul.f32 1.442695, %v103_v13 }
 0x17a   :  { %281 = vpow2.f32 %v106_v14 }
 0x180   :  { %v280_v15 = vpop.eup %279 }
 0x181   :  { %v108_v16 = vsel %vm95_vm2, %v280_v15, 0.0 }
 0x182   :  { %109 = vadd.xlane.f32.xlu1 %v108_v16 }
 0x184   :  { %v282_v17 = vpop.eup %281 }
 0x185   :  { %v111_v18 = vsel %vm95_vm2, %v282_v17, 0.0 }
 0x186   :  { %112 = vadd.xlane.f32.xlu1 %v111_v18 }
 0x20f   :  { %v110_v19 = vpop.xlane.xlu1 %109 }
 0x210   :  { %283 = vrcp.f32 %v110_v19 }
 0x213   :  { %v113_v20 = vpop.xlane.xlu1 %112 }
 0x214   :  { %285 = vrcp.f32 %v113_v20 }
 0x21a   :  { %v284_v21 = vpop.eup %283 }
 0x21b   :  { %v115_v22 = vmul.f32 %v284_v21, %v280_v15 }
 0x21d   :  { %118 = vst.msk [vmem:[#allocation2] sm:$0xff] %vm95_vm2, %v115_v22  ;;  %262 = vmatprep.mubr.msk.f32.mxu1 %vm95_vm2, %v115_v22 }
 0x21e   :  { %v286_v23 = vpop.eup %285 }
 0x21f   :  { %v117_v24 = vmul.f32 %v286_v23, %v282_v17 }
 0x221   :  { %119 = vst.msk [vmem:[#allocation2 + $0x8] sm:$0xff] %vm95_vm2, %v117_v24  ;;  %v271_v25 = vpack.c.bf16 %v117_v24, %v115_v22 }
 0x223   :  { %272 = vmatprep.subr.bf16.mxu1 %v271_v25 }
 0x224   :  { %274 = vmatpush3.bf16.msra.mxu1 %v271_v25 }
 0x227   :  { %263 = vmatmul.mubr.msk.f32.vlgmr.msra.gmra.mrb[0].mxu1 %vm95_vm2, %v117_v24 }
 0x2fa   :  { %v264_v32 = vpop.f32.mrb[0].mxu1 }
 0x2fb   :  { %v213_v33 = vmul.f32 2.0, %v264_v32  ;;  %v203_v35 = vpop.f32.mrb[1].mxu1 }
 0x2fc   :  { %v212_v36 = vmul.f32 2.0, %v203_v35 }
 0x2fd   :  { %v215_v37 = vsub.f32 %v213_v33, %v240_v31 }
 0x2fe   :  { %v214_v38 = vsub.f32 %v212_v36, %v239_v34 }
 0x2ff   :  { %218 = vst.msk [vmem:[#allocation2 + $0x18] sm:$0xff] %vm95_vm2, %v215_v37 }
 0x300   :  { %217 = vst.msk [vmem:[#allocation2 + $0x10] sm:$0xff] %vm95_vm2, %v214_v38 }
 0x301   :  { %298 = shalt.err (!%p295_p4)
}
 0x302   :  { %s299_s14 = scalar_lea.hbm %s354_s1, 512 }
 0x303   :  { %p300_p5 = scmp.ne.s32.totalorder %s354_s1, %s299_s14  ;;  %p303_p6 = scmp.lt.u32.totalorder %s299_s14, %s354_s1 }
 0x305   :  { %p305_p7 = pnand %p303_p6, %p300_p5 }
 0x307   :  { %308 = shalt.err (!%p305_p7)
}
 0x308   :  { %s313_s19 = smov 128   ;;  %s314_s20 = smov 8  }
 0x309   :  { %230 = dma.vmem_to_hbm [thread:$0]  %s225_s10, 512, %s354_s1, [#allocation3], %s313_s19, %s313_s19, %s314_s20  }
 0x30a   :  { %309 = dma.done.wait [#allocation3], 512  }
 0x30b   :  { %310 = vsyncadd [#allocation3], 4294966784 }
 0x30c   :  { %234 = vsyncpa [#allocation3], 1 }

</bundles_post_ra>
